<compile_context>
chip_gen: v6e
topology: v6e:2x2x1
jax: 0.10.0
libtpu: 0.0.40
codegen_flags: <defaults>
</compile_context>

<pallas_src>
import math
from functools import partial

import jax
import jax.numpy as jnp
from jax.experimental import pallas as pl
from jax.experimental.pallas import tpu as pltpu


# ------------------------------- VMEM budgeting ------------------------------------
def _vmem_capacity_bytes():
    try:
        info = pltpu.get_tpu_info()
        cap = getattr(info, "vmem_capacity_bytes", None)
        if cap:
            return int(cap)
    except Exception:
        pass
    return 64 << 20  # conservative (v7x-class) fallback


_VMEM_CAP = _vmem_capacity_bytes()
_VMEM_LIMIT = int(min(_VMEM_CAP * 3 // 4, 100 << 20))  # scoped VMEM limit for Mosaic


# ----------------------------- spectral mixing kernel ------------------------------
def _tile_candidates(n):
    """Descending tile sizes for a channel axis: full extent first, then multiples
    of 8 that divide n (BlockSpec second-to-last-dim constraint)."""
    cands = [n]
    t = (n // 8) * 8
    while t >= 8:
        if n % t == 0 and t != n:
            cands.append(t)
        t -= 8
    return cands


def _pick_spectral_tiles(cin, cout, mpad, budget_bytes):
    """Pick (cin_tile, cout_tile).  Prefer the full Cin (single reduction step, so the
    weight block stays VMEM-resident across the batch axis), shrinking Tco first."""
    ck_cands, co_cands = _tile_candidates(cin), _tile_candidates(cout)
    for ck in ck_cands:
        for tco in co_cands:
            w_b = 2 * ck * tco * mpad * 4          # packed re/im weight block
            x_b = 2 * ck * mpad * 4                # packed re/im x block
            o_b = 2 * tco * mpad * 4               # packed re/im out block
            # 2x for double-buffering of pipelined operands; + o_b for acc scratch.
            if 2 * (w_b + x_b + o_b) + o_b <= budget_bytes:
                return ck, tco
    return ck_cands[-1], co_cands[-1]


def _make_spectral_kernel(n_k):
    """out[o,m] = sum_i x[i,m] * w[i,o,m]  (complex, split into re/im planes).

    Block shapes:
      x_ref : (2, 1, Ck, Mpad)     w_ref : (2, Ck, Tco, Mpad)
      o_ref : (2, 1, Tco, Mpad)    acc   : (2, Tco, Mpad)  (only if n_k > 1)
    Mpad is a multiple of 128 (lane-dense)."""

    def _partials(x_ref, w_ref):
        # NOTE: the size-1 middle-axis insert is a sublane broadcast over Tco; the
        # bundle showed no relayout copies, so it is left as-is (review item #11).
        xr = x_ref[0, 0][:, None, :]          # (Ck, 1,   Mpad)
        xi = x_ref[1, 0][:, None, :]
        wr = w_ref[0]                         # (Ck, Tco, Mpad)
        wi = w_ref[1]
        pr = jnp.sum(xr * wr - xi * wi, axis=0)   # (Tco, Mpad)
        pi = jnp.sum(xr * wi + xi * wr, axis=0)
        return pr, pi

    if n_k == 1:
        def kernel(x_ref, w_ref, o_ref):
            pr, pi = _partials(x_ref, w_ref)
            o_ref[0, 0] = pr                  # each output block written exactly once
            o_ref[1, 0] = pi
    else:
        def kernel(x_ref, w_ref, o_ref, acc_ref):
            k = pl.program_id(2)
            pr, pi = _partials(x_ref, w_ref)

            @pl.when(k == 0)
            def _():
                acc_ref[0] = pr
                acc_ref[1] = pi

            @pl.when(k > 0)
            def _():
                acc_ref[0] += pr
                acc_ref[1] += pi

            @pl.when(k == n_k - 1)
            def _():
                o_ref[0, 0] = acc_ref[0]      # single writeback at the end
                o_ref[1, 0] = acc_ref[1]

    return kernel


def spectral_mix(x_pack, w_pack):
    """Packed complex einsum('bim,iom->bom').

    x_pack : (2, B, Cin, Mpad)  f32   (plane 0 = real, plane 1 = imag)
    w_pack : (2, Cin, Cout, Mpad) f32
    returns (2, B, Cout, Mpad) f32
    """
    _, b, cin, mpad = x_pack.shape
    cout = w_pack.shape[2]
    budget = min(12 << 20, _VMEM_CAP // 5)
    ck, tco = _pick_spectral_tiles(cin, cout, mpad, budget)
    n_k, n_co = cin // ck, cout // tco
    grid = (n_co, b, n_k)                      # B inner of parallel axes; reduction last
    scratch = [pltpu.VMEM((2, tco, mpad), jnp.float32)] if n_k > 1 else []
    return pl.pallas_call(
        _make_spectral_kernel(n_k),
        out_shape=jax.ShapeDtypeStruct((2, b, cout, mpad), jnp.float32),
        grid=grid,
        in_specs=[
            pl.BlockSpec((2, 1, ck, mpad), lambda co, bi, ci: (0, bi, ci, 0)),
            # weight index map is independent of bi -> block stays VMEM-resident
            # across the batch axis (fetched once per cout tile / cin tile).
            pl.BlockSpec((2, ck, tco, mpad), lambda co, bi, ci: (0, ci, co, 0)),
        ],
        out_specs=pl.BlockSpec((2, 1, tco, mpad), lambda co, bi, ci: (0, bi, co, 0)),
        scratch_shapes=scratch,
        compiler_params=pltpu.CompilerParams(
            dimension_semantics=("parallel", "parallel", "arbitrary"),
            vmem_limit_bytes=_VMEM_LIMIT),
    )(x_pack, w_pack)


# ---------------- fused 1x1 conv + bias + residual + GELU (NCHW-native) ------------
def _make_pointwise_kernel(apply_gelu):
    inv_sqrt2 = 0.7071067811865476

    def kernel(x_ref, w_ref, b_ref, x1_ref, o_ref):
        # x_ref: (1, Cin, Ts); w_ref: (Cout, Cin); b_ref: (Cout, 1)
        # x1_ref / o_ref: (1, Cout, Ts).  Output minor (lane) dim is Ts -> full vst.
        y = jnp.dot(w_ref[...], x_ref[0], preferred_element_type=jnp.float32)
        y = y + b_ref[...] + x1_ref[0]
        if apply_gelu:
            # exact (erf-based) GELU, matching torch.nn.functional.gelu default
            y = 0.5 * y * (1.0 + jax.lax.erf(y * inv_sqrt2))
        o_ref[0] = y.astype(o_ref.dtype)

    return kernel


def _pick_spatial_tile(s, cin, cout, budget_bytes):
    # s is a multiple of 128. Pick the largest multiple-of-128 divisor of s whose
    # double-buffered working set (~(cin + 2*cout) * ts * 4B * 2 buffers) stays
    # inside the VMEM budget.
    per_row = 4 * 2 * (cin + 2 * cout)
    cap = max(128, (budget_bytes // per_row) // 128 * 128)
    best, t, lim = 128, 128, min(s, cap)
    while t <= lim:
        if s % t == 0:
            best = t
        t += 128
    return best


def pointwise_conv_add_act(x_bcs, w, b, x1_bcs, *, apply_gelu):
    """y[b,o,s] = act( sum_i w[o,i] * x[b,i,s] + bias[o] + x1[b,o,s] )."""
    bsz, cin, s = x_bcs.shape
    cout = w.shape[0]
    s_pad = ((s + 127) // 128) * 128
    if s_pad != s:
        pad = ((0, 0), (0, 0), (0, s_pad - s))
        x_bcs, x1_bcs = jnp.pad(x_bcs, pad), jnp.pad(x1_bcs, pad)
    # Wider tile budget on 128-MiB-VMEM parts (v5e/v6e); conservative on v7x-class.
    budget = (20 << 20) if _VMEM_CAP >= (96 << 20) else (8 << 20)
    ts = _pick_spatial_tile(s_pad, cin, cout, budget)
    grid = (bsz, s_pad // ts)
    # (Optionally sweep pipeline_mode=pl.Buffered(3) on x/x1 specs with xprof;
    #  kept at the default double-buffering here.)
    out = pl.pallas_call(
        _make_pointwise_kernel(apply_gelu),
        out_shape=jax.ShapeDtypeStruct((bsz, cout, s_pad), jnp.float32),
        grid=grid,
        in_specs=[
            pl.BlockSpec((1, cin, ts), lambda bi, si: (bi, 0, si)),
            pl.BlockSpec((cout, cin), lambda bi, si: (0, 0)),
            pl.BlockSpec((cout, 1), lambda bi, si: (0, 0)),
            pl.BlockSpec((1, cout, ts), lambda bi, si: (bi, 0, si)),
        ],
        out_specs=pl.BlockSpec((1, cout, ts), lambda bi, si: (bi, 0, si)),
        compiler_params=pltpu.CompilerParams(
            dimension_semantics=("parallel", "parallel"),
            vmem_limit_bytes=_VMEM_LIMIT),
    )(x_bcs, w, b, x1_bcs)
    return out if s_pad == s else out[:, :, :s]


# --------------------------- weight preprocessing (hoisted) -------------------------
def prepare_spectral_weights(w1r, w1i, w2r, w2i):
    """Concat/flatten/pad the spectral weights ONCE (not per forward call).

    Returns (2, Cin, Cout, Mpad) f32 with Mpad a multiple of 128."""
    cin, cout, m1, m2 = w1r.shape
    m = 2 * m1 * m2
    mpad = max(128, ((m + 127) // 128) * 128)
    wr = jnp.concatenate([w1r, w2r], axis=2).reshape(cin, cout, m)
    wi = jnp.concatenate([w1i, w2i], axis=2).reshape(cin, cout, m)
    w_pack = jnp.stack([wr, wi], axis=0)               # (2, Cin, Cout, m)
    if mpad != m:
        w_pack = jnp.pad(w_pack, ((0, 0), (0, 0), (0, 0), (0, mpad - m)))
    return w_pack


# ----------------------------------- FNO layer --------------------------------------
def fno_layer_forward(x, params, *, modes1, modes2, last=False):
    b, cin, h, w = x.shape
    cout = params["conv_w"].shape[0]
    assert h >= 2 * modes1 and (w // 2 + 1) >= modes2, "mode counts exceed spatial grid"

    # ---- SpectralConv2d ----
    # TODO(synk): rfft2/irfft2 have no Pallas TPU primitive; they stay XLA FFT glue.
    m = 2 * modes1 * modes2
    w_pack = params["spec_w"]                                   # precomputed/padded
    mpad = w_pack.shape[-1]

    x_ft = jnp.fft.rfft2(x)                                     # (B, Cin, H, W//2+1) c64
    x_modes = jnp.concatenate(
        [x_ft[:, :, :modes1, :modes2], x_ft[:, :, h - modes1:, :modes2]], axis=2
    ).reshape(b, cin, m)                                        # (B, Cin, 2*m1*m2)
    x_pack = jnp.stack([jnp.real(x_modes), jnp.imag(x_modes)], axis=0)
    if mpad != m:
        x_pack = jnp.pad(x_pack, ((0, 0), (0, 0), (0, 0), (0, mpad - m)))

    out_pack = spectral_mix(x_pack, w_pack)                     # (2, B, Cout, Mpad)
    out_modes = jax.lax.complex(out_pack[0, :, :, :m], out_pack[1, :, :, :m])
    out_modes = out_modes.reshape(b, cout, 2 * modes1, modes2)
    # Assemble the full rfft2 spectrum with one concat + one pad (no full-size scatter).
    mid = jnp.zeros((b, cout, h - 2 * modes1, modes2), jnp.complex64)
    out_ft = jnp.pad(
        jnp.concatenate(
            [out_modes[:, :, :modes1], mid, out_modes[:, :, modes1:]], axis=2),
        ((0, 0), (0, 0), (0, 0), (0, w // 2 + 1 - modes2)))
    x1 = jnp.fft.irfft2(out_ft, s=(h, w))                       # (B, Cout, H, W) f32

    # ---- fused 1x1 conv + residual (+ GELU), NCHW-native (no HBM transposes) ----
    y = pointwise_conv_add_act(
        x.reshape(b, cin, h * w), params["conv_w"], params["conv_b"][:, None],
        x1.reshape(b, cout, h * w), apply_gelu=not last)
    return y.reshape(b, cout, h, w)


# ----------------------------- pure-JAX reference (check) ---------------------------
def ref_forward(x, params, *, modes1, modes2, last=False):
    b, cin, h, w = x.shape
    cout = params["conv_w"].shape[0]
    x_ft = jnp.fft.rfft2(x)
    w1 = params["w1r"] + 1j * params["w1i"]
    w2 = params["w2r"] + 1j * params["w2i"]
    out_ft = jnp.zeros((b, cout, h, w // 2 + 1), jnp.complex64)
    out_ft = out_ft.at[:, :, :modes1, :modes2].set(
        jnp.einsum("bixt,ioxt->boxt", x_ft[:, :, :modes1, :modes2], w1))
    out_ft = out_ft.at[:, :, h - modes1:, :modes2].set(
        jnp.einsum("bixt,ioxt->boxt", x_ft[:, :, h - modes1:, :modes2], w2))
    x1 = jnp.fft.irfft2(out_ft, s=(h, w))
    x2 = (jnp.einsum("oi,bihw->bohw", params["conv_w"], x)
          + params["conv_b"][None, :, None, None])
    y = x1 + x2
    if not last:
        y = 0.5 * y * (1.0 + jax.scipy.special.erf(y / jnp.sqrt(2.0)))
    return y


if __name__ == "__main__":
    B, WIDTH, H, W = 2, 8, 16, 16
    MODES1, MODES2 = 4, 4
    LAST = False

    key = jax.random.PRNGKey(0)
    kx, k1, k2, k3, k4, k5, k6 = jax.random.split(key, 7)
    scale = 1.0 / (WIDTH * WIDTH)
    bound = 1.0 / math.sqrt(WIDTH)  # torch Conv2d default init bound (fan_in=width*1*1)
    params = {
        # SpectralConv2d: cfloat weights -> stored as separate real/imag planes
        "w1r": scale * jax.random.uniform(k1, (WIDTH, WIDTH, MODES1, MODES2), jnp.float32),
        "w1i": scale * jax.random.uniform(k2, (WIDTH, WIDTH, MODES1, MODES2), jnp.float32),
        "w2r": scale * jax.random.uniform(k3, (WIDTH, WIDTH, MODES1, MODES2), jnp.float32),
        "w2i": scale * jax.random.uniform(k4, (WIDTH, WIDTH, MODES1, MODES2), jnp.float32),
        # nn.Conv2d(width, width, 1): weight (O, I, 1, 1) stored as (O, I), bias (O,)
        "conv_w": jax.random.uniform(k5, (WIDTH, WIDTH), jnp.float32, -bound, bound),
        "conv_b": jax.random.uniform(k6, (WIDTH,), jnp.float32, -bound, bound),
    }
    # Hoisted weight preprocessing: concat/flatten/pad the spectral weights once.
    params["spec_w"] = prepare_spectral_weights(
        params["w1r"], params["w1i"], params["w2r"], params["w2i"])

    x = jax.random.normal(kx, (B, WIDTH, H, W), jnp.float32)

    fwd = jax.jit(partial(fno_layer_forward, modes1=MODES1, modes2=MODES2, last=LAST))
    out = jax.block_until_ready(fwd(x, params))

    ref = ref_forward(x, params, modes1=MODES1, modes2=MODES2, last=LAST)
    assert out.shape == (B, WIDTH, H, W) and out.dtype == jnp.float32
    max_err = float(jnp.max(jnp.abs(out - ref)))
    assert jnp.allclose(out, ref, rtol=1e-4, atol=1e-4), max_err
    print("KERNEL_OK")
</pallas_src>

<mosaic_0001>
module attributes {stable_mosaic.version = 11 : i64} {
  func.func @kernel(%arg0: i32, %arg1: i32, %arg2: i32, %arg3: memref<2x1x8x128xf32, #tpu.memory_space<vmem>>, %arg4: memref<2x8x8x128xf32, #tpu.memory_space<vmem>>, %arg5: memref<2x1x8x128xf32, #tpu.memory_space<vmem>>) attributes {dimension_semantics = [#tpu.dimension_semantics<parallel>, #tpu.dimension_semantics<parallel>, #tpu.dimension_semantics<arbitrary>], iteration_bounds = array<i64: 1, 2, 1>, scalar_prefetch = 0 : i64, scratch_operands = 0 : i64, tpu.core_type = #tpu.core_type<tc>, window_params = [{transform_indices = @transform_0, window_bounds = array<i64: 2, 1, 8, 128>}, {transform_indices = @transform_1, window_bounds = array<i64: 2, 8, 8, 128>}, {transform_indices = @transform_2, window_bounds = array<i64: 2, 1, 8, 128>}]} {
    %c0 = arith.constant 0 : index
    %c0_0 = arith.constant 0 : index
    %c0_1 = arith.constant 0 : index
    %c0_2 = arith.constant 0 : index
    %0 = vector.load %arg3[%c0, %c0_0, %c0_1, %c0_2] : memref<2x1x8x128xf32, #tpu.memory_space<vmem>>, vector<1x1x8x128xf32>
    %1 = vector.shape_cast %0 : vector<1x1x8x128xf32> to vector<8x128xf32>
    %2 = vector.shape_cast %1 : vector<8x128xf32> to vector<8x1x128xf32>
    %c1 = arith.constant 1 : index
    %c0_3 = arith.constant 0 : index
    %c0_4 = arith.constant 0 : index
    %c0_5 = arith.constant 0 : index
    %3 = vector.load %arg3[%c1, %c0_3, %c0_4, %c0_5] : memref<2x1x8x128xf32, #tpu.memory_space<vmem>>, vector<1x1x8x128xf32>
    %4 = vector.shape_cast %3 : vector<1x1x8x128xf32> to vector<8x128xf32>
    %5 = vector.shape_cast %4 : vector<8x128xf32> to vector<8x1x128xf32>
    %c0_6 = arith.constant 0 : index
    %c0_7 = arith.constant 0 : index
    %c0_8 = arith.constant 0 : index
    %c0_9 = arith.constant 0 : index
    %6 = vector.load %arg4[%c0_6, %c0_7, %c0_8, %c0_9] : memref<2x8x8x128xf32, #tpu.memory_space<vmem>>, vector<1x8x8x128xf32>
    %7 = vector.shape_cast %6 : vector<1x8x8x128xf32> to vector<8x8x128xf32>
    %c1_10 = arith.constant 1 : index
    %c0_11 = arith.constant 0 : index
    %c0_12 = arith.constant 0 : index
    %c0_13 = arith.constant 0 : index
    %8 = vector.load %arg4[%c1_10, %c0_11, %c0_12, %c0_13] : memref<2x8x8x128xf32, #tpu.memory_space<vmem>>, vector<1x8x8x128xf32>
    %9 = vector.shape_cast %8 : vector<1x8x8x128xf32> to vector<8x8x128xf32>
    %10 = vector.broadcast %2 : vector<8x1x128xf32> to vector<8x8x128xf32>
    %11 = arith.mulf %10, %7 : vector<8x8x128xf32>
    %12 = vector.broadcast %5 : vector<8x1x128xf32> to vector<8x8x128xf32>
    %13 = arith.mulf %12, %9 : vector<8x8x128xf32>
    %14 = arith.subf %11, %13 : vector<8x8x128xf32>
    %cst = arith.constant dense<0.000000e+00> : vector<8x128xf32>
    %15 = vector.multi_reduction <add>, %14, %cst [0] : vector<8x8x128xf32> to vector<8x128xf32>
    %16 = vector.broadcast %2 : vector<8x1x128xf32> to vector<8x8x128xf32>
    %17 = arith.mulf %16, %9 : vector<8x8x128xf32>
    %18 = vector.broadcast %5 : vector<8x1x128xf32> to vector<8x8x128xf32>
    %19 = arith.mulf %18, %7 : vector<8x8x128xf32>
    %20 = arith.addf %17, %19 : vector<8x8x128xf32>
    %cst_14 = arith.constant dense<0.000000e+00> : vector<8x128xf32>
    %21 = vector.multi_reduction <add>, %20, %cst_14 [0] : vector<8x8x128xf32> to vector<8x128xf32>
    %c0_15 = arith.constant 0 : index
    %c0_16 = arith.constant 0 : index
    %c0_17 = arith.constant 0 : index
    %c0_18 = arith.constant 0 : index
    %22 = vector.load %arg5[%c0_15, %c0_16, %c0_17, %c0_18] : memref<2x1x8x128xf32, #tpu.memory_space<vmem>>, vector<1x1x8x128xf32>
    %23 = vector.shape_cast %22 : vector<1x1x8x128xf32> to vector<8x128xf32>
    %24 = vector.shape_cast %15 : vector<8x128xf32> to vector<1x1x8x128xf32>
    tpu.vector_store %arg5[%c0_15, %c0_16, %c0_17, %c0_18], %24 {strides = array<i32>} : memref<2x1x8x128xf32, #tpu.memory_space<vmem>>, vector<1x1x8x128xf32>,
    %c1_19 = arith.constant 1 : index
    %c0_20 = arith.constant 0 : index
    %c0_21 = arith.constant 0 : index
    %c0_22 = arith.constant 0 : index
    %25 = vector.load %arg5[%c1_19, %c0_20, %c0_21, %c0_22] : memref<2x1x8x128xf32, #tpu.memory_space<vmem>>, vector<1x1x8x128xf32>
    %26 = vector.shape_cast %25 : vector<1x1x8x128xf32> to vector<8x128xf32>
    %27 = vector.shape_cast %21 : vector<8x128xf32> to vector<1x1x8x128xf32>
    tpu.vector_store %arg5[%c1_19, %c0_20, %c0_21, %c0_22], %27 {strides = array<i32>} : memref<2x1x8x128xf32, #tpu.memory_space<vmem>>, vector<1x1x8x128xf32>,
    return
  }
  func.func @transform_0(%arg0: i32, %arg1: i32, %arg2: i32) -> (i32, i32, i32, i32) {
    %c0_i32 = arith.constant 0 : i32
    %c0_i32_0 = arith.constant 0 : i32
    %c0_i32_1 = arith.constant 0 : i32
    return %c0_i32, %arg1, %arg2, %c0_i32_0 : i32, i32, i32, i32
  }
  func.func @transform_1(%arg0: i32, %arg1: i32, %arg2: i32) -> (i32, i32, i32, i32) {
    %c0_i32 = arith.constant 0 : i32
    %c0_i32_0 = arith.constant 0 : i32
    %c0_i32_1 = arith.constant 0 : i32
    return %c0_i32, %arg2, %arg0, %c0_i32_0 : i32, i32, i32, i32
  }
  func.func @transform_2(%arg0: i32, %arg1: i32, %arg2: i32) -> (i32, i32, i32, i32) {
    %c0_i32 = arith.constant 0 : i32
    %c0_i32_0 = arith.constant 0 : i32
    %c0_i32_1 = arith.constant 0 : i32
    return %c0_i32, %arg1, %arg0, %c0_i32_0 : i32, i32, i32, i32
  }
}

module attributes {stable_mosaic.version = 11 : i64} {
  func.func @kernel(%arg0: i32, %arg1: i32, %arg2: memref<1x8x256xf32, #tpu.memory_space<vmem>>, %arg3: memref<8x8xf32, #tpu.memory_space<vmem>>, %arg4: memref<8x1xf32, #tpu.memory_space<vmem>>, %arg5: memref<1x8x256xf32, #tpu.memory_space<vmem>>, %arg6: memref<1x8x256xf32, #tpu.memory_space<vmem>>) attributes {dimension_semantics = [#tpu.dimension_semantics<parallel>, #tpu.dimension_semantics<parallel>], iteration_bounds = array<i64: 2, 1>, scalar_prefetch = 0 : i64, scratch_operands = 0 : i64, tpu.core_type = #tpu.core_type<tc>, window_params = [{transform_indices = @transform_0, window_bounds = array<i64: 1, 8, 256>}, {pipeline_mode = #tpu.pipeline_mode<synchronous>, transform_indices = @transform_1, window_bounds = array<i64: 8, 8>}, {pipeline_mode = #tpu.pipeline_mode<synchronous>, transform_indices = @transform_2, window_bounds = array<i64: 8, 1>}, {transform_indices = @transform_3, window_bounds = array<i64: 1, 8, 256>}, {transform_indices = @transform_4, window_bounds = array<i64: 1, 8, 256>}]} {
    %c0 = arith.constant 0 : index
    %c0_0 = arith.constant 0 : index
    %0 = vector.load %arg3[%c0, %c0_0] : memref<8x8xf32, #tpu.memory_space<vmem>>, vector<8x8xf32>
    %c0_1 = arith.constant 0 : index
    %c0_2 = arith.constant 0 : index
    %c0_3 = arith.constant 0 : index
    %1 = vector.load %arg2[%c0_1, %c0_2, %c0_3] : memref<1x8x256xf32, #tpu.memory_space<vmem>>, vector<1x8x256xf32>
    %2 = vector.shape_cast %1 : vector<1x8x256xf32> to vector<8x256xf32>
    %cst = arith.constant dense<0.000000e+00> : vector<8x256xf32>
    %3 = tpu.matmul %0, %2, %cst {dimension_numbers = #tpu.dot_dimension_numbers<[1], [0], [0], [1], [0, 0, 1, 1], [], []>} : vector<8x8xf32>, vector<8x256xf32>, vector<8x256xf32> -> vector<8x256xf32>
    %c0_4 = arith.constant 0 : index
    %c0_5 = arith.constant 0 : index
    %4 = vector.load %arg4[%c0_4, %c0_5] : memref<8x1xf32, #tpu.memory_space<vmem>>, vector<8x1xf32>
    %5 = vector.broadcast %4 : vector<8x1xf32> to vector<8x256xf32>
    %6 = arith.addf %3, %5 : vector<8x256xf32>
    %c0_6 = arith.constant 0 : index
    %c0_7 = arith.constant 0 : index
    %c0_8 = arith.constant 0 : index
    %7 = vector.load %arg5[%c0_6, %c0_7, %c0_8] : memref<1x8x256xf32, #tpu.memory_space<vmem>>, vector<1x8x256xf32>
    %8 = vector.shape_cast %7 : vector<1x8x256xf32> to vector<8x256xf32>
    %9 = arith.addf %6, %8 : vector<8x256xf32>
    %cst_9 = arith.constant 5.000000e-01 : f32
    %10 = vector.broadcast %cst_9 : f32 to vector<8x256xf32>
    %11 = arith.mulf %10, %9 : vector<8x256xf32>
    %cst_10 = arith.constant 0.707106769 : f32
    %12 = vector.broadcast %cst_10 : f32 to vector<8x256xf32>
    %13 = arith.mulf %9, %12 : vector<8x256xf32>
    %14 = math.erf %13 : vector<8x256xf32>
    %cst_11 = arith.constant 1.000000e+00 : f32
    %15 = vector.broadcast %cst_11 : f32 to vector<8x256xf32>
    %16 = arith.addf %15, %14 : vector<8x256xf32>
    %17 = arith.mulf %11, %16 : vector<8x256xf32>
    %c0_12 = arith.constant 0 : index
    %c0_13 = arith.constant 0 : index
    %c0_14 = arith.constant 0 : index
    %18 = vector.load %arg6[%c0_12, %c0_13, %c0_14] : memref<1x8x256xf32, #tpu.memory_space<vmem>>, vector<1x8x256xf32>
    %19 = vector.shape_cast %18 : vector<1x8x256xf32> to vector<8x256xf32>
    %20 = vector.shape_cast %17 : vector<8x256xf32> to vector<1x8x256xf32>
    tpu.vector_store %arg6[%c0_12, %c0_13, %c0_14], %20 {strides = array<i32>} : memref<1x8x256xf32, #tpu.memory_space<vmem>>, vector<1x8x256xf32>,
    return
  }
  func.func @transform_0(%arg0: i32, %arg1: i32) -> (i32, i32, i32) {
    %c0_i32 = arith.constant 0 : i32
    %c0_i32_0 = arith.constant 0 : i32
    return %arg0, %c0_i32, %arg1 : i32, i32, i32
  }
  func.func @transform_1(%arg0: i32, %arg1: i32) -> (i32, i32) {
    %c0_i32 = arith.constant 0 : i32
    %c0_i32_0 = arith.constant 0 : i32
    %c0_i32_1 = arith.constant 0 : i32
    return %c0_i32, %c0_i32_0 : i32, i32
  }
  func.func @transform_2(%arg0: i32, %arg1: i32) -> (i32, i32) {
    %c0_i32 = arith.constant 0 : i32
    %c0_i32_0 = arith.constant 0 : i32
    %c0_i32_1 = arith.constant 0 : i32
    return %c0_i32, %c0_i32_0 : i32, i32
  }
  func.func @transform_3(%arg0: i32, %arg1: i32) -> (i32, i32, i32) {
    %c0_i32 = arith.constant 0 : i32
    %c0_i32_0 = arith.constant 0 : i32
    return %arg0, %c0_i32, %arg1 : i32, i32, i32
  }
  func.func @transform_4(%arg0: i32, %arg1: i32) -> (i32, i32, i32) {
    %c0_i32 = arith.constant 0 : i32
    %c0_i32_0 = arith.constant 0 : i32
    return %arg0, %c0_i32, %arg1 : i32, i32, i32
  }
}

</mosaic_0001>

<bundles_post_ra>
// kernel: fno_layer_forward.2
= control target key start
LH: loop header
LB: loop body
LE: loop exit
PB: predicated region body
PF: predicated region fallthrough
CT: control target
= control target key end

     0   :  { %s757_s9 = smov 0   ;;  %s759_s10 = smov 0   ;;  %s881_s0 = inlined_call_operand.vmem [shape: f32[2,2,8,128], index: 0, kind: input, shape index: {}]   ;;  %s882_s1 = inlined_call_operand.vmem [shape: f32[2,8,8,128], index: 1, kind: input, shape index: {}]   ;;  %s883_s2 = inlined_call_operand.vmem [shape: f32[2,2,8,128], index: 2, kind: output, shape index: {}]  }
   0x1   :  { %s761_s11 = smov 0   ;;  %s763_s12 = smov 0  }
   0x2   :  { %s765_s13 = smov 0  }
   0x3 LB: > { %s27_s14 = sadd.s32 1, %s735_s12  ;;  %s634_s15 = sadd.s32 4294967295, %s739_s13   ;;  %s739_s13 = sphi %s765_s13, %s12_s13   ;;  %s735_s12 = sphi %s763_s12, %s888_s12   ;;  %s731_s11 = sphi %s761_s11, %s887_s11   ;;  %s727_s10 = sphi %s759_s10, %s886_s10   ;;  %s723_s9 = sphi %s757_s9, %s885_s9  }
   0x4   : > { %p29_p0 = scmp.ge.s32.totalorder %s27_s14, 2  ;;  %p47_p1 = scmp.ne.s32.totalorder %s727_s10, %s723_s9 }
   0x5   : > { %p48_p2 = scmp.eq.s32.totalorder %s739_s13, 0  ;;  %p107_p4 = scmp.eq.s32.totalorder %s634_s15, 1 }
   0x6   : > { %s890_s14 = smov (%p29_p0, %s27_s14), 0  ;;  %s40_s17 = sadd.s32 1, %s727_s10 }
   0x7   : > { %p49_p3 = por %p48_p2, %p47_p1  ;;  %s35_s16 = ssub.s32 %s735_s12, %s890_s14 }
   0x8   : > { %p38_p5 = scmp.eq.s32.totalorder %s35_s16, 0  ;;  %p792_p6 = por %p107_p4, %p47_p1 }
   0x9   : > { %p638_p7 = scmp.ge.s32.totalorder %s739_s13, 2 }
   0xa   : > { %s797_s19 = scalar_select %p38_p5, %s727_s10, %s40_s17  }
   0xb   : > { %141 = sbr.rel (%p638_p7) target bundleno = 21 (0x15), region = 20 }
  0x10   : > { %144 = sbr.rel (!%p49_p3) target bundleno = 21 (0x15), region = 24  ;;  %s146_s20 = sand.u32 (%p49_p3), 1, %s727_s10  }
  0x11   : > { %s640_s21 = sshll.u32 (%p49_p3), %s735_s12, 3  ;;  %s639_s22 = sshll.u32 (%p49_p3), %s146_s20, 4 }
  0x12   : > { %s151_s25 = scalar_lea.vmem (%p49_p3), %s881_s0, %s640_s21  ;;  %s148_s26 = scalar_lea.vmem (%p49_p3), [#allocation2], %s639_s22 }
  0x13   : > { %v182_v0 = vld [vmem:[%s151_s25] sm:$0xff] (%p49_p3)  ;;  %v184_v1 = vld [vmem:[%s151_s25 + $0x10] sm:$0xff] (%p49_p3) }
  0x14   : > { %183 = vst [vmem:[%s148_s26] sm:$0xff] (%p49_p3), %v182_v0  ;;  %185 = vst [vmem:[%s148_s26 + $0x8] sm:$0xff] (%p49_p3), %v184_v1 }
  0x15 PF: > { %p641_p8 = scmp.ge.s32.totalorder %s739_s13, 1  ;;  %p190_p9 = scmp.lt.s32.totalorder %s739_s13, 3 }
  0x17   : > { %p191_p10 = pnand %p641_p8, %p190_p9 }
  0x18   : > { %s197_s27 = sand.u32 (!%p191_p10), 1, %s723_s9  }
  0x19   : > { %194 = sbr.rel (%p191_p10) target bundleno = 82 (0x52), region = 62  ;;  %s808_s28 = sshll.u32 (!%p191_p10), %s197_s27, 4 }
  0x1a   : > { %s199_s29 = scalar_lea.vmem (!%p191_p10), [#allocation2], %s808_s28  ;;  %s224_s21 = scalar_lea.vmem (!%p191_p10), [#allocation3], %s808_s28 }
  0x1e   : > { %v240_v2 = vlaneseq  ;;  %v741_v3 = vmov 1966171168   ;;  %v234_v6 = vld [vmem:[%s199_s29] sm:$0xff]  ;;  %v644_v8 = vld [vmem:[%s199_s29 + $0x8] sm:$0xff]  ;;  %s655_s22 = sshll.u32 (%p792_p6), %s731_s11, 3 }
  0x1f   : > { %v238_v4 = vunpack.c.l.s4 %v741_v3  ;;  %v236_v9 = vcombine.high %v234_v6, %v234_v6  ;;  %v288_v10 = vcombine.high %v644_v8, %v644_v8  ;;  %v337_v35 = vld [vmem:[%s882_s1] sm:$0xff]  ;;  %v338_v36 = vld [vmem:[%s882_s1 + $0x8] sm:$0xff]  ;;  %v339_v37 = vld [vmem:[%s882_s1 + $0x10] sm:$0xff]  ;;  %s508_s25 = scalar_lea.vmem (%p792_p6), %s883_s2, %s655_s22 }
  0x20   : > { %v241_v5 = vshrl.u32 %v240_v2, 7  ;;  %v340_v44 = vld [vmem:[%s882_s1 + $0x18] sm:$0xff]  ;;  %v645_v45 = vld [vmem:[%s882_s1 + $0x40] sm:$0xff]  ;;  %v646_v46 = vld [vmem:[%s882_s1 + $0x48] sm:$0xff] }
  0x21   : > { %v239_v7 = vunpack.c.0.s8 %v238_v4  ;;  %v647_v47 = vld [vmem:[%s882_s1 + $0x50] sm:$0xff]  ;;  %v648_v48 = vld [vmem:[%s882_s1 + $0x58] sm:$0xff]  ;;  %v341_v53 = vld [vmem:[%s882_s1 + $0x20] sm:$0xff] }
  0x22   : > { %v356_v19 = vsub.s32 0, %v241_v5  ;;  %v649_v58 = vld [vmem:[%s882_s1 + $0x60] sm:$0xff]  ;;  %v342_v63 = vld [vmem:[%s882_s1 + $0x28] sm:$0xff] }
  0x23   : > { %v242_v11 = vsub.s32 %v239_v7, %v241_v5  ;;  %v650_v4 = vld [vmem:[%s882_s1 + $0x68] sm:$0xff] }
  0x25   : > { %v243_v12 = vrot.slane %v234_v6, %v242_v11  ;;  %v250_v13 = vrot.slane %v236_v9, %v242_v11  ;;  %v295_v14 = vrot.slane %v644_v8, %v242_v11  ;;  %v302_v15 = vrot.slane %v288_v10, %v242_v11  ;;  %v343_v8 = vld [vmem:[%s882_s1 + $0x30] sm:$0xff] }
  0x26   : > { %v651_v9 = vld [vmem:[%s882_s1 + $0x70] sm:$0xff] }
  0x27   : > { %v251_v16 = vcombine.high %v243_v12, %v243_v12  ;;  %v252_v17 = vcombine.high %v250_v13, %v250_v13  ;;  %v259_v18 = vrot.slane %v243_v12, %v242_v11  ;;  %v303_v20 = vcombine.high %v295_v14, %v295_v14 }
  0x28   : > { %v304_v21 = vcombine.high %v302_v15, %v302_v15  ;;  %v311_v22 = vrot.slane %v295_v14, %v242_v11  ;;  %v266_v25 = vrot.slane %v250_v13, %v242_v11  ;;  %v318_v26 = vrot.slane %v302_v15, %v242_v11 }
  0x29   : > { %v273_v23 = vrot.slane %v251_v16, %v242_v11  ;;  %v281_v24 = vcombine.high %v259_v18, %v259_v18  ;;  %v325_v27 = vrot.slane %v303_v20, %v242_v11  ;;  %v280_v28 = vrot.slane %v252_v17, %v242_v11  ;;  %v344_v17 = vld [vmem:[%s882_s1 + $0x38] sm:$0xff] }
  0x2a   : > { %v357_v30 = vrot.slane %v259_v18, %v356_v19  ;;  %v332_v32 = vrot.slane %v304_v21, %v242_v11  ;;  %v333_v33 = vcombine.high %v311_v22, %v311_v22  ;;  %v282_v40 = vcombine.high %v266_v25, %v266_v25 }
  0x2b   : > { %v283_v29 = vcombine.high %v273_v23, %v273_v23  ;;  %v361_v31 = vrot.slane %v273_v23, %v356_v19  ;;  %v335_v34 = vcombine.high %v325_v27, %v325_v27  ;;  %v365_v38 = vrot.slane %v281_v24, %v356_v19  ;;  %v652_v23 = vld [vmem:[%s882_s1 + $0x78] sm:$0xff] }
  0x2c   : > { %v284_v41 = vcombine.high %v280_v28, %v280_v28  ;;  %v334_v42 = vcombine.high %v318_v26, %v318_v26  ;;  %v336_v43 = vcombine.high %v332_v32, %v332_v32  ;;  %v373_v49 = vrot.slane %v266_v25, %v356_v19 }
  0x2d   : > { %v369_v39 = vrot.slane %v283_v29, %v356_v19  ;;  %v394_v50 = vmul.f32 %v357_v30, %v337_v35  ;;  %v395_v51 = vmul.f32 %v361_v31, %v338_v36  ;;  %v396_v52 = vmul.f32 %v365_v38, %v339_v37 }
  0x2e   : > { %v405_v54 = vrot.slane %v311_v22, %v356_v19  ;;  %v409_v55 = vrot.slane %v325_v27, %v356_v19  ;;  %v413_v56 = vrot.slane %v333_v33, %v356_v19  ;;  %v417_v57 = vrot.slane %v335_v34, %v356_v19 }
  0x2f   : > { %v377_v59 = vrot.slane %v280_v28, %v356_v19  ;;  %v397_v60 = vmul.f32 %v369_v39, %v340_v44  ;;  %v421_v61 = vrot.slane %v318_v26, %v356_v19  ;;  %v425_v62 = vrot.slane %v332_v32, %v356_v19 }
  0x30   : > { %v442_v0 = vmul.f32 %v645_v45, %v405_v54  ;;  %v443_v1 = vmul.f32 %v646_v46, %v409_v55  ;;  %v444_v2 = vmul.f32 %v647_v47, %v413_v56  ;;  %v445_v3 = vmul.f32 %v648_v48, %v417_v57 }
  0x31   : > { %v381_v5 = vrot.slane %v282_v40, %v356_v19  ;;  %v398_v6 = vmul.f32 %v373_v49, %v341_v53  ;;  %v429_v7 = vrot.slane %v334_v42, %v356_v19  ;;  %v446_v10 = vmul.f32 %v649_v58, %v421_v61 }
  0x32   : > { %v450_v11 = vsub.f32 %v394_v50, %v442_v0  ;;  %v451_v12 = vsub.f32 %v395_v51, %v443_v1  ;;  %v452_v13 = vsub.f32 %v396_v52, %v444_v2  ;;  %v385_v14 = vrot.slane %v284_v41, %v356_v19 }
  0x33   : > { %v399_v15 = vmul.f32 %v377_v59, %v342_v63  ;;  %v433_v16 = vrot.slane %v336_v43, %v356_v19  ;;  %v447_v18 = vmul.f32 %v650_v4, %v425_v62  ;;  %v453_v20 = vsub.f32 %v397_v60, %v445_v3 }
  0x34   : > { %v458_v21 = vadd.f32 %v451_v12, %v450_v11  ;;  %v465_v22 = vmul.f32 %v645_v45, %v357_v30  ;;  %v400_v24 = vmul.f32 %v381_v5, %v343_v8  ;;  %v448_v25 = vmul.f32 %v651_v9, %v429_v7 }
  0x35   : > { %v466_v26 = vmul.f32 %v646_v46, %v361_v31  ;;  %v467_v27 = vmul.f32 %v647_v47, %v365_v38  ;;  %v454_v28 = vsub.f32 %v398_v6, %v446_v10  ;;  %v473_v32 = vmul.f32 %v405_v54, %v337_v35 }
  0x36   : > { %v459_v29 = vadd.f32 %v458_v21, %v452_v13  ;;  %v474_v19 = vmul.f32 %v409_v55, %v338_v36  ;;  %v401_v33 = vmul.f32 %v385_v14, %v344_v17  ;;  %v468_v34 = vmul.f32 %v648_v48, %v369_v39 }
  0x37   : > { %v475_v40 = vmul.f32 %v413_v56, %v339_v37  ;;  %v476_v41 = vmul.f32 %v417_v57, %v340_v44  ;;  %v449_v42 = vmul.f32 %v652_v23, %v433_v16  ;;  %v455_v43 = vsub.f32 %v399_v15, %v447_v18 }
  0x38   : > { %v460_v50 = vadd.f32 %v459_v29, %v453_v20  ;;  %v481_v30 = vadd.f32 %v473_v32, %v465_v22  ;;  %v469_v45 = vmul.f32 %v649_v58, %v373_v49  ;;  %v477_v51 = vmul.f32 %v421_v61, %v341_v53 }
  0x39   : > { %v482_v52 = vadd.f32 %v474_v19, %v466_v26  ;;  %v483_v60 = vadd.f32 %v475_v40, %v467_v27  ;;  %v456_v0 = vsub.f32 %v400_v24, %v448_v25  ;;  %v470_v31 = vmul.f32 %v650_v4, %v377_v59 }
  0x3a   : > { %v461_v1 = vadd.f32 %v460_v50, %v454_v28  ;;  %v478_v38 = vmul.f32 %v425_v62, %v342_v63  ;;  %v484_v46 = vadd.f32 %v476_v41, %v468_v34  ;;  %v457_v36 = vsub.f32 %v401_v33, %v449_v42 }
  0x3b   : > { %v489_v35 = vadd.f32 %v482_v52, %v481_v30  ;;  %v471_v39 = vmul.f32 %v651_v9, %v381_v5  ;;  %v479_v37 = vmul.f32 %v429_v7, %v343_v8  ;;  %v485_v44 = vadd.f32 %v477_v51, %v469_v45 }
  0x3c   : > { %v462_v47 = vadd.f32 %v461_v1, %v455_v43  ;;  %v472_v55 = vmul.f32 %v652_v23, %v385_v14  ;;  %v480_v56 = vmul.f32 %v433_v16, %v344_v17  ;;  %v486_v49 = vadd.f32 %v478_v38, %v470_v31 }
  0x3d   : > { %v490_v48 = vadd.f32 %v489_v35, %v483_v60  ;;  %v487_v58 = vadd.f32 %v479_v37, %v471_v39 }
  0x3e   : > { %v463_v54 = vadd.f32 %v462_v47, %v456_v0  ;;  %v488_v59 = vadd.f32 %v480_v56, %v472_v55 }
  0x3f   : > { %v491_v53 = vadd.f32 %v490_v48, %v484_v46 }
  0x40   : > { %v464_v57 = vadd.f32 %v463_v54, %v457_v36 }
  0x41   : > { %v492_v61 = vadd.f32 %v491_v53, %v485_v44 }
  0x42   : > { %496 = vst [vmem:[%s224_s21] sm:$0xff] %v464_v57 }
  0x43   : > { %v493_v62 = vadd.f32 %v492_v61, %v486_v49 }
  0x45   : > { %v494_v63 = vadd.f32 %v493_v62, %v487_v58  ;;  %505 = sbr.rel (!%p792_p6) target bundleno = 82 (0x52), region = 70 }
  0x47   : > { %v495_v2 = vadd.f32 %v494_v63, %v488_v59 }
  0x49   : > { %653 = vst [vmem:[%s224_s21 + $0x8] sm:$0xff] %v495_v2  ;;  %v539_v3 = vld [vmem:[%s224_s21] sm:$0xff] (%p792_p6) }
  0x4a   : > { %540 = vst [vmem:[%s508_s25] sm:$0xff] %v539_v3 }
  0x50   : > { %v541_v4 = vld [vmem:[%s224_s21 + $0x8] sm:$0xff] }
  0x51   : > { %542 = vst [vmem:[%s508_s25 + $0x10] sm:$0xff] %v541_v4 }
  0x52 PF: > { %s12_s13 = sadd.s32 1, %s739_s13   ;;  %s885_s9 = smov %s727_s10 }
  0x53   : > { %p9_p11 = scmp.ge.s32.totalorder %s12_s13, 4   ;;  %s886_s10 = smov %s797_s19 }
  0x54   : > { %s887_s11 = smov %s735_s12  ;;  %s888_s12 = smov %s890_s14 }
  0x55   :  { %11 = sbr.rel (!%p9_p11) target bundleno = 3 (0x3), region = 145 }

// kernel: reverse.0
= control target key start
LH: loop header
LB: loop body
LE: loop exit
PB: predicated region body
PF: predicated region fallthrough
CT: control target
= control target key end

     0   :  { %v104_v3 = vlaneseq  ;;  %v97_v18 = vld [vmem:[#allocation0 + $0x7] ss:$-1 sm:$0xff]  ;;  %v111_v19 = vld [vmem:[#allocation0 + $0x17] ss:$-1 sm:$0xff]  ;;  %s606_s0 = inlined_call_operand.vmem [shape: f32[2,8,16,7], index: 0, kind: input, shape index: {}]   ;;  %s607_s1 = inlined_call_operand.vmem [shape: f32[2,8,16,7], index: 1, kind: output, shape index: {}]  }
   0x1   :  { %v61_v0 = vld [vmem:[%s606_s0] sm:$0xff]  ;;  %v63_v1 = vld [vmem:[%s606_s0 + $0x8] sm:$0xff]  ;;  %v65_v2 = vld [vmem:[%s606_s0 + $0x10] sm:$0xff]  ;;  %v98_v20 = vrot.slane %v97_v18, 1  ;;  %v112_v21 = vrot.slane %v111_v19, 1 }
   0x2   :  { %62 = vst [vmem:[#allocation0 + $0x8] sm:$0xff] %v61_v0  ;;  %64 = vst [vmem:[#allocation0 + $0x18] sm:$0xff] %v63_v1  ;;  %v67_v4 = vld [vmem:[%s606_s0 + $0x18] sm:$0xff]  ;;  %v69_v5 = vld [vmem:[%s606_s0 + $0x20] sm:$0xff]  ;;  %v502_v10 = vshrl.u32 %v104_v3, 7 }
   0x3   :  { %66 = vst [vmem:[#allocation0 + $0x28] sm:$0xff] %v65_v2  ;;  %v71_v6 = vld [vmem:[%s606_s0 + $0x28] sm:$0xff]  ;;  %68 = vst [vmem:[#allocation0 + $0x38] sm:$0xff] %v67_v4  ;;  %v73_v7 = vld [vmem:[%s606_s0 + $0x30] sm:$0xff] }
   0x4   :  { %70 = vst [vmem:[#allocation0 + $0x48] sm:$0xff] %v69_v5  ;;  %72 = vst [vmem:[#allocation0 + $0x58] sm:$0xff] %v71_v6  ;;  %v75_v8 = vld [vmem:[%s606_s0 + $0x38] sm:$0xff]  ;;  %v77_v9 = vld [vmem:[%s606_s0 + $0x40] sm:$0xff]  ;;  %vm106_vm0 = vcmp.lt.s32.totalorder %v502_v10, 7 }
   0x5   :  { %74 = vst [vmem:[#allocation0 + $0x68] sm:$0xff] %v73_v7  ;;  %76 = vst [vmem:[#allocation0 + $0x78] sm:$0xff] %v75_v8  ;;  %v79_v11 = vld [vmem:[%s606_s0 + $0x48] sm:$0xff]  ;;  %v81_v12 = vld [vmem:[%s606_s0 + $0x50] sm:$0xff] }
   0x6   :  { %78 = vst [vmem:[#allocation0 + $0x88] sm:$0xff] %v77_v9  ;;  %v83_v13 = vld [vmem:[%s606_s0 + $0x58] sm:$0xff]  ;;  %80 = vst [vmem:[#allocation0 + $0x98] sm:$0xff] %v79_v11  ;;  %v85_v14 = vld [vmem:[%s606_s0 + $0x60] sm:$0xff] }
   0x7   :  { %82 = vst [vmem:[#allocation0 + $0xa8] sm:$0xff] %v81_v12  ;;  %84 = vst [vmem:[#allocation0 + $0xb8] sm:$0xff] %v83_v13  ;;  %v87_v15 = vld [vmem:[%s606_s0 + $0x68] sm:$0xff]  ;;  %v89_v16 = vld [vmem:[%s606_s0 + $0x70] sm:$0xff] }
   0x8   :  { %86 = vst [vmem:[#allocation0 + $0xc8] sm:$0xff] %v85_v14  ;;  %88 = vst [vmem:[#allocation0 + $0xd8] sm:$0xff] %v87_v15  ;;  %v91_v17 = vld [vmem:[%s606_s0 + $0x78] sm:$0xff]  ;;  %v125_v22 = vld [vmem:[#allocation0 + $0x27] ss:$-1 sm:$0xff] }
   0x9   :  { %90 = vst [vmem:[#allocation0 + $0xe8] sm:$0xff] %v89_v16  ;;  %92 = vst [vmem:[#allocation0 + $0xf8] sm:$0xff] %v91_v17  ;;  %v139_v23 = vld [vmem:[#allocation0 + $0x37] ss:$-1 sm:$0xff]  ;;  %v126_v24 = vrot.slane %v125_v22, 1 }
   0xa   :  { %v140_v25 = vrot.slane %v139_v23, 1  ;;  %v153_v26 = vld [vmem:[#allocation0 + $0x47] ss:$-1 sm:$0xff]  ;;  %v167_v27 = vld [vmem:[#allocation0 + $0x57] ss:$-1 sm:$0xff]  ;;  %99 = vst [vmem:[#allocation1] sm:$0xff] %v98_v20 }
   0xb   :  { %v102_v28 = vld [vmem:[#allocation0 + $0xf] ss:$-1 sm:$0xff]  ;;  %113 = vst [vmem:[#allocation1 + $0x8] sm:$0xff] %v112_v21  ;;  %v116_v29 = vld [vmem:[#allocation0 + $0x1f] ss:$-1 sm:$0xff]  ;;  %127 = vst [vmem:[#allocation1 + $0x10] sm:$0xff] %v126_v24 }
   0xc   :  { %v130_v30 = vld [vmem:[#allocation0 + $0x2f] ss:$-1 sm:$0xff]  ;;  %v103_v31 = vrot.slane %v102_v28, 1  ;;  %v117_v32 = vrot.slane %v116_v29, 1  ;;  %141 = vst [vmem:[#allocation1 + $0x18] sm:$0xff] %v140_v25  ;;  %v154_v35 = vrot.slane %v153_v26, 1 }
   0xd   :  { %v131_v33 = vrot.slane %v130_v30, 1  ;;  %v144_v34 = vld [vmem:[#allocation0 + $0x3f] ss:$-1 sm:$0xff]  ;;  %v158_v37 = vld [vmem:[#allocation0 + $0x4f] ss:$-1 sm:$0xff]  ;;  %v168_v38 = vrot.slane %v167_v27, 1 }
   0xe   :  { %v145_v36 = vrot.slane %v144_v34, 1  ;;  %v172_v39 = vld [vmem:[#allocation0 + $0x5f] ss:$-1 sm:$0xff]  ;;  %107 = vst.msk [vmem:[#allocation1] sm:$0xff] %vm106_vm0, %v103_v31  ;;  %121 = vst.msk [vmem:[#allocation1 + $0x8] sm:$0xff] %vm106_vm0, %v117_v32  ;;  %v159_v40 = vrot.slane %v158_v37, 1 }
   0xf   :  { %135 = vst.msk [vmem:[#allocation1 + $0x10] sm:$0xff] %vm106_vm0, %v131_v33  ;;  %155 = vst [vmem:[#allocation1 + $0x20] sm:$0xff] %v154_v35  ;;  %v173_v41 = vrot.slane %v172_v39, 1  ;;  %v181_v42 = vld [vmem:[#allocation0 + $0x67] ss:$-1 sm:$0xff] }
  0x10   :  { %v186_v43 = vld [vmem:[#allocation0 + $0x6f] ss:$-1 sm:$0xff]  ;;  %149 = vst.msk [vmem:[#allocation1 + $0x18] sm:$0xff] %vm106_vm0, %v145_v36  ;;  %169 = vst [vmem:[#allocation1 + $0x28] sm:$0xff] %v168_v38  ;;  %v182_v44 = vrot.slane %v181_v42, 1 }
  0x11   :  { %v187_v45 = vrot.slane %v186_v43, 1  ;;  %v195_v46 = vld [vmem:[#allocation0 + $0x77] ss:$-1 sm:$0xff]  ;;  %v200_v47 = vld [vmem:[#allocation0 + $0x7f] ss:$-1 sm:$0xff]  ;;  %163 = vst.msk [vmem:[#allocation1 + $0x20] sm:$0xff] %vm106_vm0, %v159_v40 }
  0x12   :  { %177 = vst.msk [vmem:[#allocation1 + $0x28] sm:$0xff] %vm106_vm0, %v173_v41  ;;  %v196_v48 = vrot.slane %v195_v46, 1  ;;  %v201_v49 = vrot.slane %v200_v47, 1  ;;  %v209_v50 = vld [vmem:[#allocation0 + $0x87] ss:$-1 sm:$0xff]  ;;  %183 = vst [vmem:[#allocation1 + $0x30] sm:$0xff] %v182_v44 }
  0x13   :  { %v214_v51 = vld [vmem:[#allocation0 + $0x8f] ss:$-1 sm:$0xff]  ;;  %v210_v52 = vrot.slane %v209_v50, 1  ;;  %v223_v54 = vld [vmem:[#allocation0 + $0x97] ss:$-1 sm:$0xff]  ;;  %191 = vst.msk [vmem:[#allocation1 + $0x30] sm:$0xff] %vm106_vm0, %v187_v45 }
  0x14   :  { %v215_v53 = vrot.slane %v214_v51, 1  ;;  %v228_v55 = vld [vmem:[#allocation0 + $0x9f] ss:$-1 sm:$0xff]  ;;  %197 = vst [vmem:[#allocation1 + $0x38] sm:$0xff] %v196_v48  ;;  %v224_v56 = vrot.slane %v223_v54, 1 }
  0x15   :  { %v229_v57 = vrot.slane %v228_v55, 1  ;;  %v237_v58 = vld [vmem:[#allocation0 + $0xa7] ss:$-1 sm:$0xff]  ;;  %v242_v59 = vld [vmem:[#allocation0 + $0xaf] ss:$-1 sm:$0xff]  ;;  %205 = vst.msk [vmem:[#allocation1 + $0x38] sm:$0xff] %vm106_vm0, %v201_v49 }
  0x16   :  { %211 = vst [vmem:[#allocation1 + $0x40] sm:$0xff] %v210_v52  ;;  %v238_v60 = vrot.slane %v237_v58, 1  ;;  %v243_v61 = vrot.slane %v242_v59, 1  ;;  %v251_v62 = vld [vmem:[#allocation0 + $0xb7] ss:$-1 sm:$0xff]  ;;  %225 = vst [vmem:[#allocation1 + $0x48] sm:$0xff] %v224_v56 }
  0x17   :  { %v256_v63 = vld [vmem:[#allocation0 + $0xbf] ss:$-1 sm:$0xff]  ;;  %219 = vst.msk [vmem:[#allocation1 + $0x40] sm:$0xff] %vm106_vm0, %v215_v53  ;;  %v252_v0 = vrot.slane %v251_v62, 1  ;;  %v265_v2 = vld [vmem:[#allocation0 + $0xc7] ss:$-1 sm:$0xff] }
  0x18   :  { %v257_v1 = vrot.slane %v256_v63, 1  ;;  %v270_v3 = vld [vmem:[#allocation0 + $0xcf] ss:$-1 sm:$0xff]  ;;  %233 = vst.msk [vmem:[#allocation1 + $0x48] sm:$0xff] %vm106_vm0, %v229_v57  ;;  %239 = vst [vmem:[#allocation1 + $0x50] sm:$0xff] %v238_v60  ;;  %v266_v4 = vrot.slane %v265_v2, 1 }
  0x19   :  { %v271_v5 = vrot.slane %v270_v3, 1  ;;  %v279_v6 = vld [vmem:[#allocation0 + $0xd7] ss:$-1 sm:$0xff]  ;;  %v284_v7 = vld [vmem:[#allocation0 + $0xdf] ss:$-1 sm:$0xff]  ;;  %247 = vst.msk [vmem:[#allocation1 + $0x50] sm:$0xff] %vm106_vm0, %v243_v61 }
  0x1a   :  { %253 = vst [vmem:[#allocation1 + $0x58] sm:$0xff] %v252_v0  ;;  %v280_v8 = vrot.slane %v279_v6, 1  ;;  %v285_v9 = vrot.slane %v284_v7, 1  ;;  %v293_v11 = vld [vmem:[#allocation0 + $0xe7] ss:$-1 sm:$0xff]  ;;  %267 = vst [vmem:[#allocation1 + $0x60] sm:$0xff] %v266_v4 }
  0x1b   :  { %v298_v12 = vld [vmem:[#allocation0 + $0xef] ss:$-1 sm:$0xff]  ;;  %261 = vst.msk [vmem:[#allocation1 + $0x58] sm:$0xff] %vm106_vm0, %v257_v1  ;;  %v294_v13 = vrot.slane %v293_v11, 1  ;;  %v307_v15 = vld [vmem:[#allocation0 + $0xf7] ss:$-1 sm:$0xff] }
  0x1c   :  { %v299_v14 = vrot.slane %v298_v12, 1  ;;  %v312_v16 = vld [vmem:[#allocation0 + $0xff] ss:$-1 sm:$0xff]  ;;  %275 = vst.msk [vmem:[#allocation1 + $0x60] sm:$0xff] %vm106_vm0, %v271_v5  ;;  %281 = vst [vmem:[#allocation1 + $0x68] sm:$0xff] %v280_v8  ;;  %v308_v17 = vrot.slane %v307_v15, 1 }
  0x1d   :  { %v313_v18 = vrot.slane %v312_v16, 1  ;;  %v376_v19 = vld [vmem:[#allocation1] sm:$0xff]  ;;  %v378_v20 = vld [vmem:[#allocation1 + $0x8] sm:$0xff]  ;;  %v380_v21 = vld [vmem:[#allocation1 + $0x10] sm:$0xff]  ;;  %289 = vst.msk [vmem:[#allocation1 + $0x68] sm:$0xff] %vm106_vm0, %v285_v9 }
  0x1e   :  { %295 = vst [vmem:[#allocation1 + $0x70] sm:$0xff] %v294_v13  ;;  %377 = vst [vmem:[%s607_s1] sm:$0xff] %v376_v19  ;;  %v382_v22 = vld [vmem:[#allocation1 + $0x18] sm:$0xff]  ;;  %v384_v23 = vld [vmem:[#allocation1 + $0x20] sm:$0xff] }
  0x1f   :  { %379 = vst [vmem:[%s607_s1 + $0x8] sm:$0xff] %v378_v20  ;;  %381 = vst [vmem:[%s607_s1 + $0x10] sm:$0xff] %v380_v21  ;;  %v386_v24 = vld [vmem:[#allocation1 + $0x28] sm:$0xff]  ;;  %v388_v25 = vld [vmem:[#allocation1 + $0x30] sm:$0xff] }
  0x20   :  { %303 = vst.msk [vmem:[#allocation1 + $0x70] sm:$0xff] %vm106_vm0, %v299_v14  ;;  %309 = vst [vmem:[#allocation1 + $0x78] sm:$0xff] %v308_v17  ;;  %v390_v26 = vld [vmem:[#allocation1 + $0x38] sm:$0xff]  ;;  %v392_v10 = vld [vmem:[#allocation1 + $0x40] sm:$0xff] }
  0x21   :  { %383 = vst [vmem:[%s607_s1 + $0x18] sm:$0xff] %v382_v22  ;;  %385 = vst [vmem:[%s607_s1 + $0x20] sm:$0xff] %v384_v23  ;;  %v394_v27 = vld [vmem:[#allocation1 + $0x48] sm:$0xff]  ;;  %v396_v28 = vld [vmem:[#allocation1 + $0x50] sm:$0xff] }
  0x22   :  { %387 = vst [vmem:[%s607_s1 + $0x28] sm:$0xff] %v386_v24  ;;  %317 = vst.msk [vmem:[#allocation1 + $0x78] sm:$0xff] %vm106_vm0, %v313_v18  ;;  %v398_v29 = vld [vmem:[#allocation1 + $0x58] sm:$0xff] }
  0x23   :  { %389 = vst [vmem:[%s607_s1 + $0x30] sm:$0xff] %v388_v25  ;;  %391 = vst [vmem:[%s607_s1 + $0x38] sm:$0xff] %v390_v26  ;;  %v400_v30 = vld [vmem:[#allocation1 + $0x60] sm:$0xff] }
  0x24   :  { %393 = vst [vmem:[%s607_s1 + $0x40] sm:$0xff] %v392_v10  ;;  %395 = vst [vmem:[%s607_s1 + $0x48] sm:$0xff] %v394_v27  ;;  %v402_v31 = vld [vmem:[#allocation1 + $0x68] sm:$0xff] }
  0x25   :  { %397 = vst [vmem:[%s607_s1 + $0x50] sm:$0xff] %v396_v28  ;;  %399 = vst [vmem:[%s607_s1 + $0x58] sm:$0xff] %v398_v29 }
  0x26   :  { %401 = vst [vmem:[%s607_s1 + $0x60] sm:$0xff] %v400_v30  ;;  %403 = vst [vmem:[%s607_s1 + $0x68] sm:$0xff] %v402_v31 }
  0x27   :  { %v404_v32 = vld [vmem:[#allocation1 + $0x70] sm:$0xff] }
  0x28   :  { %405 = vst [vmem:[%s607_s1 + $0x70] sm:$0xff] %v404_v32 }
  0x29   :  { %v406_v33 = vld [vmem:[#allocation1 + $0x78] sm:$0xff] }
  0x2a   :  { %407 = vst [vmem:[%s607_s1 + $0x78] sm:$0xff] %v406_v33 }

// kernel: fno_layer_forward.3
= control target key start
LH: loop header
LB: loop body
LE: loop exit
PB: predicated region body
PF: predicated region fallthrough
CT: control target
= control target key end

     0   :  { %s577_s15 = smov 0   ;;  %s579_s16 = smov 0   ;;  %s619_s0 = inlined_call_operand.vmem [shape: f32[2,8,256], index: 0, kind: input, shape index: {}]   ;;  %s620_s1 = inlined_call_operand.vmem [shape: f32[8,8], index: 1, kind: input, shape index: {}]   ;;  %s621_s2 = inlined_call_operand.vmem [shape: f32[8,1], index: 2, kind: input, shape index: {}]   ;;  %s622_s3 = inlined_call_operand.vmem [shape: f32[2,8,256], index: 3, kind: input, shape index: {}]   ;;  %s623_s4 = inlined_call_operand.vmem [shape: f32[2,8,256], index: 4, kind: output, shape index: {}]  }
   0x1   :  { %s581_s17 = smov 0  }
   0x2 LB: > { %s26_s18 = sadd.s32 1, %s544_s16  ;;  %p482_p0 = scmp.ge.s32.totalorder %s548_s17, 1  ;;  %s548_s17 = sphi %s581_s17, %s14_s17   ;;  %s544_s16 = sphi %s579_s16, %s625_s16   ;;  %s540_s15 = sphi %s577_s15, %s624_s15  }
   0x3   : > { %p28_p1 = scmp.ge.s32.totalorder %s26_s18, 2  ;;  %p200_p2 = scmp.lt.s32.totalorder %s548_s17, 3 }
   0x5   : > { %s627_s18 = smov (%p28_p1, %s26_s18), 0  ;;  %p201_p3 = pnand %p482_p0, %p200_p2 }
   0x6   : > { %p244_p4 = scmp.lt.s32.totalorder (!%p201_p3), %s540_s15, 1 }
   0x7   : > { %204 = sbr.rel (%p201_p3) target bundleno = 238 (0xee), region = 36 }
   0xc   : > { %v276_v0 = vld [vmem:[%s621_s2] sm:$0xff]  ;;  %v550_v1 = vmov 0.0   ;;  %v551_v2 = vmov 0   ;;  %s629_s15 = smov (!%p244_p4, %s540_s15), 1  ;;  %vm282_vm0 = vcmask 64512  }
   0xd   : > { %350 = vmatprep.mubr.f32.mxu0 %v550_v1  ;;  %521 = vset.pattern.permute.xlu0 %v551_v2  ;;  %s492_s21 = sshll.u32 %s629_s15, 4  ;;  %v273_v5 = vld [vmem:[%s620_s1] sm:$0xff] }
   0xe   : > { %279 = vperm.xlu0 %521, %v276_v0   ;;  %s251_s24 = scalar_lea.vmem %s619_s0, %s492_s21  ;;  %s261_s29 = scalar_lea.vmem %s622_s3, %s492_s21 }
   0xf   : > { %v275_v3 = vld [vmem:[%s251_s24 + $0x8] sm:$0xff]  ;;  %v274_v4 = vld [vmem:[%s251_s24] sm:$0xff]  ;;  %s271_s6 = scalar_lea.vmem %s623_s4, %s492_s21 }
  0x10   : > { %316 = vmatprep.subr.mxu0 %v275_v3  ;;  %v357_v8 = vld [vmem:[%s261_s29] sm:$0xff]  ;;  %v358_v11 = vld [vmem:[%s261_s29 + $0x8] sm:$0xff] }
  0x11   : > { %317 = vmatpush1.msra.mxu0 %v274_v4 }
  0x12   : > { %489 = vmatmul.mubr.msk.f32.vlgmr.msra.gmra.mxu0 %vm282_vm0, %v273_v5 }
  0x89   : > { %v280_v6 = vpop.permute.xlu0 %279 }
  0xd2   : > { %v352_v7 = vpop.f32.mrf.mxu0 }
  0xd3   : > { %v353_v9 = vadd.f32 %v352_v7, %v280_v6 }
  0xd4   : > { %v354_v10 = vpop.f32.mrf.mxu0 }
  0xd5   : > { %v359_v12 = vadd.f32 %v357_v8, %v353_v9  ;;  %v355_v13 = vadd.f32 %v354_v10, %v280_v6 }
  0xd7   : > { %v363_v14 = vmul.f32 0.70710677, %v359_v12  ;;  %v360_v15 = vadd.f32 %v358_v11, %v355_v13  ;;  %v361_v18 = vmul.f32 0.5, %v359_v12 }
  0xd9   : > { %522 = verf.f32 %v363_v14  ;;  %v364_v16 = vmul.f32 0.70710677, %v360_v15  ;;  %v362_v22 = vmul.f32 0.5, %v360_v15 }
  0xdb   : > { %524 = verf.f32 %v364_v16 }
  0xe6   : > { %v523_v17 = vpop.eup %522 }
  0xe7   : > { %v367_v19 = vadd.f32 1.0, %v523_v17 }
  0xe8   : > { %v525_v20 = vpop.eup %524 }
  0xe9   : > { %v369_v21 = vmul.f32 %v367_v19, %v361_v18  ;;  %v368_v23 = vadd.f32 1.0, %v525_v20 }
  0xeb   : > { %371 = vst [vmem:[%s271_s6] sm:$0xff] %v369_v21  ;;  %v370_v24 = vmul.f32 %v368_v23, %v362_v22 }
  0xed   : > { %372 = vst [vmem:[%s271_s6 + $0x8] sm:$0xff] %v370_v24 }
  0xee PF: > { %s14_s17 = sadd.s32 1, %s548_s17   ;;  %s624_s15 = smov %s544_s16 }
  0xef   : > { %p11_p5 = scmp.ge.s32.totalorder %s14_s17, 4   ;;  %s625_s16 = smov %s627_s18 }
  0xf1   :  { %13 = sbr.rel (!%p11_p5) target bundleno = 2 (0x2), region = 69 }

</bundles_post_ra>
